<compile_context>
chip_gen: v6e
topology: v6e:2x2x1
jax: 0.10.0
libtpu: 0.0.40
codegen_flags: <defaults>
</compile_context>

<pallas_src>
import jax
import jax.numpy as jnp
import numpy as np
from jax.experimental import pallas as pl
from jax.experimental.pallas import tpu as pltpu


# ----------------------------------------------------------------------------- kernel ---
def decoder_kernel(feat_ref, infb_ref,
                   w1_ref, b1_ref,
                   w2_ref, b2_ref,
                   w3at_ref,
                   out_ref):
    # decoder1: Linear + ReLU, Linear + ReLU.
    # Inputs are cast to the (pre-cast) weight dtype; MXU dots accumulate in f32 and the
    # bias add / ReLU stay f32 (no bf16 VPU on v5e).  The in-kernel cast is a free VPU op
    # and avoids a separate HBM read/write pass in the wrapper.
    x = feat_ref[...].astype(w1_ref.dtype)
    h1 = jnp.dot(x, w1_ref[...], preferred_element_type=jnp.float32)
    h1 = jnp.maximum(h1 + b1_ref[...], 0.0)

    h2 = jnp.dot(h1.astype(w2_ref.dtype), w2_ref[...],
                 preferred_element_type=jnp.float32)
    h2 = jnp.maximum(h2 + b2_ref[...], 0.0)

    # decoder2 (info path hoisted to wrapper):
    #   out.T = W3[:128].T @ h2.T + (info @ W3[128:] + b3).T
    # w3at is stored as (2, 128); contracting both operands on their last axis gives the
    # lane-dense (2, bm) result straight from the MXU (no narrow masked tile, no XLU
    # transpose of the output).
    out_t = jax.lax.dot_general(
        w3at_ref[...], h2.astype(w3at_ref.dtype),
        dimension_numbers=(((1,), (1,)), ((), ())),
        preferred_element_type=jnp.float32)                    # (2, bm)

    out_ref[...] = (out_t + infb_ref[...]).astype(out_ref.dtype)


# ---------------------------------------------------------------------------- wrapper ---
def _round_up(x, m):
    return ((x + m - 1) // m) * m


def default_matmul_dtype():
    """bf16 on real TPUs (MXU native), f32 on any other backend (keeps dots supported)."""
    try:
        platform = jax.devices()[0].platform
    except Exception:  # pragma: no cover
        platform = "cpu"
    return jnp.bfloat16 if platform == "tpu" else jnp.float32


def cast_params(params, dtype):
    """One-time cast of the matmul weights; biases and the tiny info-path stay f32."""
    w1, b1, w2, b2, w3at, w3b, b3 = params
    return (w1.astype(dtype), b1, w2.astype(dtype), b2, w3at.astype(dtype), w3b, b3)


def decoder_forward(feat, info, params, *, block_m=512):
    """Decoder forward pass.

    params = (w1[F,256], b1[1,256], w2[256,128], b2[1,128],
              w3a_t[2,128] (= W3[:, :128] transposed), w3b[3,2], b3[1,2])
    Weights may be pre-cast (e.g. bf16) with cast_params(); the kernel casts `feat` and
    the intermediate activations to the weight dtype internally.
    """
    B, F = feat.shape
    w1, b1, w2, b2, w3at, w3b, b3 = params
    H1 = w1.shape[1]      # 256
    H2 = w2.shape[1]      # 128
    OUT = w3at.shape[0]   # 2

    # Hoisted tiny info path: (B,3)@(3,2)+b3, f32, transposed so the extra kernel input
    # is lane-dense and matches the transposed output tile.
    info_bias_t = (info.astype(jnp.float32) @ w3b + b3).T      # (OUT, B)

    # M-tile:
    #   * B <= 256 : single grid step (latency regime, minimal pipeline overhead).
    #   * B  > 256 : at most block_m rows, but capped at round_up(ceil(B/2), 128) so the
    #                "parallel" grid axis always has >= 2 steps (both v7x TensorCores).
    if B <= 256:
        bm = B
    else:
        bm = min(block_m, _round_up(pl.cdiv(B, 2), 128))
    grid = (pl.cdiv(B, bm),)

    out_t = pl.pallas_call(
        decoder_kernel,
        out_shape=jax.ShapeDtypeStruct((OUT, B), jnp.float32),
        grid_spec=pltpu.PrefetchScalarGridSpec(
            num_scalar_prefetch=0,
            grid=grid,
            in_specs=[
                pl.BlockSpec((bm, F), lambda i: (i, 0)),      # feat tile (cast in kernel)
                pl.BlockSpec((OUT, bm), lambda i: (0, i)),    # info@W3b + b3 (transposed)
                pl.BlockSpec((F, H1), lambda i: (0, 0)),      # W1 (resident)
                pl.BlockSpec((1, H1), lambda i: (0, 0)),      # b1
                pl.BlockSpec((H1, H2), lambda i: (0, 0)),     # W2
                pl.BlockSpec((1, H2), lambda i: (0, 0)),      # b2
                pl.BlockSpec((OUT, H2), lambda i: (0, 0)),    # W3[:128] transposed (2,128)
            ],
            out_specs=pl.BlockSpec((OUT, bm), lambda i: (0, i)),
        ),
        compiler_params=pltpu.CompilerParams(
            dimension_semantics=("parallel",)),
    )(feat, info_bias_t, w1, b1, w2, b2, w3at)

    return out_t.T                                             # (B, OUT)


# ----------------------------------------------------------------------- params / ref ---
def init_params(key, feat_dim=512):
    # Deterministic init mimicking PyTorch Linear default U(-1/sqrt(in), 1/sqrt(in)).
    def linear(key, fan_in, fan_out):
        kw, kb = jax.random.split(key)
        bound = 1.0 / np.sqrt(fan_in)
        # stored as [in, out] (transposed vs. PyTorch's [out, in])
        w = jax.random.uniform(kw, (fan_in, fan_out), jnp.float32, -bound, bound)
        b = jax.random.uniform(kb, (1, fan_out), jnp.float32, -bound, bound)
        return w, b

    k1, k2, k3 = jax.random.split(key, 3)
    w1, b1 = linear(k1, feat_dim, 256)
    w2, b2 = linear(k2, 256, 128)
    w3, b3 = linear(k3, 128 + 3, 2)
    w3a_t = jnp.transpose(w3[:128, :])   # (2, 128), pre-transposed for the kernel
    w3b = w3[128:, :]                    # (3, 2)
    return (w1, b1, w2, b2, w3a_t, w3b, b3)


def decoder_ref(feat, info, params):
    w1, b1, w2, b2, w3a_t, w3b, b3 = params
    h = jnp.maximum(feat @ w1 + b1, 0.0)
    h = jnp.maximum(h @ w2 + b2, 0.0)
    cat = jnp.concatenate([h, info], axis=1)
    w3 = jnp.concatenate([jnp.transpose(w3a_t), w3b], axis=0)
    return cat @ w3 + b3


# ------------------------------------------------------------------------------- main ---
if __name__ == "__main__":
    key = jax.random.PRNGKey(0)
    k_feat, k_info, k_params = jax.random.split(key, 3)

    FEAT_DIM = 512  # fixed by the module's __init__
    params_f32 = init_params(k_params, FEAT_DIM)

    # One-time weight cast outside the hot path (bf16 on TPU, f32 elsewhere).
    dt = default_matmul_dtype()
    params = cast_params(params_f32, dt)

    # --- Small latency-regime batch: single grid step. ---
    B = 8
    feat = jax.random.normal(k_feat, (B, FEAT_DIM), jnp.float32)
    info = jax.random.normal(k_info, (B, 3), jnp.float32)
    ref = decoder_ref(feat, info, params_f32)

    # Exact-math path (f32 weights): tight numerical check of the kernel algebra.
    out_f32 = jax.block_until_ready(decoder_forward(feat, info, params_f32))
    assert out_f32.shape == (B, 2)
    np.testing.assert_allclose(np.asarray(out_f32), np.asarray(ref),
                               rtol=1e-5, atol=1e-5)

    # Production path (bf16 weights on TPU, f32 fallback elsewhere): looser tolerance.
    out_prod = jax.block_until_ready(decoder_forward(feat, info, params))
    assert out_prod.shape == (B, 2)
    np.testing.assert_allclose(np.asarray(out_prod), np.asarray(ref),
                               rtol=2e-2, atol=3e-2)

    # --- Multi-block batch: bm=256 -> 2 parallel grid steps (both v7x TensorCores). ---
    B2 = 512
    kf2, ki2 = jax.random.split(jax.random.PRNGKey(1))
    feat2 = jax.random.normal(kf2, (B2, FEAT_DIM), jnp.float32)
    info2 = jax.random.normal(ki2, (B2, 3), jnp.float32)
    ref2 = decoder_ref(feat2, info2, params_f32)
    out2 = jax.block_until_ready(decoder_forward(feat2, info2, params))
    assert out2.shape == (B2, 2)
    np.testing.assert_allclose(np.asarray(out2), np.asarray(ref2),
                               rtol=2e-2, atol=3e-2)

    print("KERNEL_OK")
</pallas_src>

<mosaic_0001>
module attributes {stable_mosaic.version = 11 : i64} {
  func.func @decoder_kernel(%arg0: i32, %arg1: memref<8x512xf32, #tpu.memory_space<vmem>>, %arg2: memref<2x8xf32, #tpu.memory_space<vmem>>, %arg3: memref<512x256xf32, #tpu.memory_space<vmem>>, %arg4: memref<1x256xf32, #tpu.memory_space<vmem>>, %arg5: memref<256x128xf32, #tpu.memory_space<vmem>>, %arg6: memref<1x128xf32, #tpu.memory_space<vmem>>, %arg7: memref<2x128xf32, #tpu.memory_space<vmem>>, %arg8: memref<2x8xf32, #tpu.memory_space<vmem>>) attributes {dimension_semantics = [#tpu.dimension_semantics<parallel>], iteration_bounds = array<i64: 1>, scalar_prefetch = 0 : i64, scratch_operands = 0 : i64, tpu.core_type = #tpu.core_type<tc>, window_params = [{transform_indices = @transform_0, window_bounds = array<i64: 8, 512>}, {transform_indices = @transform_1, window_bounds = array<i64: 2, 8>}, {pipeline_mode = #tpu.pipeline_mode<synchronous>, transform_indices = @transform_2, window_bounds = array<i64: 512, 256>}, {pipeline_mode = #tpu.pipeline_mode<synchronous>, transform_indices = @transform_3, window_bounds = array<i64: 1, 256>}, {pipeline_mode = #tpu.pipeline_mode<synchronous>, transform_indices = @transform_4, window_bounds = array<i64: 256, 128>}, {pipeline_mode = #tpu.pipeline_mode<synchronous>, transform_indices = @transform_5, window_bounds = array<i64: 1, 128>}, {pipeline_mode = #tpu.pipeline_mode<synchronous>, transform_indices = @transform_6, window_bounds = array<i64: 2, 128>}, {transform_indices = @transform_7, window_bounds = array<i64: 2, 8>}]} {
    %c0 = arith.constant 0 : index
    %c0_0 = arith.constant 0 : index
    %0 = vector.load %arg1[%c0, %c0_0] : memref<8x512xf32, #tpu.memory_space<vmem>>, vector<8x512xf32>
    %c0_1 = arith.constant 0 : index
    %c0_2 = arith.constant 0 : index
    %1 = vector.load %arg3[%c0_1, %c0_2] : memref<512x256xf32, #tpu.memory_space<vmem>>, vector<512x256xf32>
    %cst = arith.constant dense<0.000000e+00> : vector<8x256xf32>
    %2 = tpu.matmul %0, %1, %cst {dimension_numbers = #tpu.dot_dimension_numbers<[1], [0], [0], [1], [0, 0, 1, 1], [], []>} : vector<8x512xf32>, vector<512x256xf32>, vector<8x256xf32> -> vector<8x256xf32>
    %c0_3 = arith.constant 0 : index
    %c0_4 = arith.constant 0 : index
    %3 = vector.load %arg4[%c0_3, %c0_4] : memref<1x256xf32, #tpu.memory_space<vmem>>, vector<1x256xf32>
    %4 = vector.broadcast %3 : vector<1x256xf32> to vector<8x256xf32>
    %5 = arith.addf %2, %4 : vector<8x256xf32>
    %cst_5 = arith.constant 0.000000e+00 : f32
    %6 = vector.broadcast %cst_5 : f32 to vector<8x256xf32>
    %7 = arith.maximumf %5, %6 : vector<8x256xf32>
    %c0_6 = arith.constant 0 : index
    %c0_7 = arith.constant 0 : index
    %8 = vector.load %arg5[%c0_6, %c0_7] : memref<256x128xf32, #tpu.memory_space<vmem>>, vector<256x128xf32>
    %cst_8 = arith.constant dense<0.000000e+00> : vector<8x128xf32>
    %9 = tpu.matmul %7, %8, %cst_8 {dimension_numbers = #tpu.dot_dimension_numbers<[1], [0], [0], [1], [0, 0, 1, 1], [], []>} : vector<8x256xf32>, vector<256x128xf32>, vector<8x128xf32> -> vector<8x128xf32>
    %c0_9 = arith.constant 0 : index
    %c0_10 = arith.constant 0 : index
    %10 = vector.load %arg6[%c0_9, %c0_10] : memref<1x128xf32, #tpu.memory_space<vmem>>, vector<1x128xf32>
    %11 = vector.broadcast %10 : vector<1x128xf32> to vector<8x128xf32>
    %12 = arith.addf %9, %11 : vector<8x128xf32>
    %cst_11 = arith.constant 0.000000e+00 : f32
    %13 = vector.broadcast %cst_11 : f32 to vector<8x128xf32>
    %14 = arith.maximumf %12, %13 : vector<8x128xf32>
    %c0_12 = arith.constant 0 : index
    %c0_13 = arith.constant 0 : index
    %15 = vector.load %arg7[%c0_12, %c0_13] : memref<2x128xf32, #tpu.memory_space<vmem>>, vector<2x128xf32>
    %cst_14 = arith.constant dense<0.000000e+00> : vector<2x8xf32>
    %16 = tpu.matmul %15, %14, %cst_14 {dimension_numbers = #tpu.dot_dimension_numbers<[1], [1], [0], [0], [0, 0, 1, 0], [], []>} : vector<2x128xf32>, vector<8x128xf32>, vector<2x8xf32> -> vector<2x8xf32>
    %c0_15 = arith.constant 0 : index
    %c0_16 = arith.constant 0 : index
    %17 = vector.load %arg2[%c0_15, %c0_16] : memref<2x8xf32, #tpu.memory_space<vmem>>, vector<2x8xf32>
    %18 = arith.addf %16, %17 : vector<2x8xf32>
    %c0_17 = arith.constant 0 : index
    %c0_18 = arith.constant 0 : index
    %19 = vector.load %arg8[%c0_17, %c0_18] : memref<2x8xf32, #tpu.memory_space<vmem>>, vector<2x8xf32>
    tpu.vector_store %arg8[%c0_17, %c0_18], %18 {strides = array<i32>} : memref<2x8xf32, #tpu.memory_space<vmem>>, vector<2x8xf32>,
    return
  }
  func.func @transform_0(%arg0: i32) -> (i32, i32) {
    %c0_i32 = arith.constant 0 : i32
    %c0_i32_0 = arith.constant 0 : i32
    return %arg0, %c0_i32 : i32, i32
  }
  func.func @transform_1(%arg0: i32) -> (i32, i32) {
    %c0_i32 = arith.constant 0 : i32
    %c0_i32_0 = arith.constant 0 : i32
    return %c0_i32, %arg0 : i32, i32
  }
  func.func @transform_2(%arg0: i32) -> (i32, i32) {
    %c0_i32 = arith.constant 0 : i32
    %c0_i32_0 = arith.constant 0 : i32
    %c0_i32_1 = arith.constant 0 : i32
    return %c0_i32, %c0_i32_0 : i32, i32
  }
  func.func @transform_3(%arg0: i32) -> (i32, i32) {
    %c0_i32 = arith.constant 0 : i32
    %c0_i32_0 = arith.constant 0 : i32
    %c0_i32_1 = arith.constant 0 : i32
    return %c0_i32, %c0_i32_0 : i32, i32
  }
  func.func @transform_4(%arg0: i32) -> (i32, i32) {
    %c0_i32 = arith.constant 0 : i32
    %c0_i32_0 = arith.constant 0 : i32
    %c0_i32_1 = arith.constant 0 : i32
    return %c0_i32, %c0_i32_0 : i32, i32
  }
  func.func @transform_5(%arg0: i32) -> (i32, i32) {
    %c0_i32 = arith.constant 0 : i32
    %c0_i32_0 = arith.constant 0 : i32
    %c0_i32_1 = arith.constant 0 : i32
    return %c0_i32, %c0_i32_0 : i32, i32
  }
  func.func @transform_6(%arg0: i32) -> (i32, i32) {
    %c0_i32 = arith.constant 0 : i32
    %c0_i32_0 = arith.constant 0 : i32
    %c0_i32_1 = arith.constant 0 : i32
    return %c0_i32, %c0_i32_0 : i32, i32
  }
  func.func @transform_7(%arg0: i32) -> (i32, i32) {
    %c0_i32 = arith.constant 0 : i32
    %c0_i32_0 = arith.constant 0 : i32
    return %c0_i32, %arg0 : i32, i32
  }
}

</mosaic_0001>

<bundles_post_ra>
// kernel: tpu_custom_call.1
= control target key start
LH: loop header
LB: loop body
LE: loop exit
PB: predicated region body
PF: predicated region fallthrough
CT: control target
= control target key end

     0   :  { %12 = vsyncpa [#allocation3], 0  ;;  %s804_s0 = inlined_call_operand.hbm [shape: f32[8,512], index: 0, kind: input, shape index: {}]   ;;  %s805_s1 = inlined_call_operand.hbm [shape: f32[2,8], index: 1, kind: input, shape index: {}]   ;;  %s806_s2 = inlined_call_operand.hbm [shape: f32[512,256], index: 2, kind: input, shape index: {}]   ;;  %s807_s3 = inlined_call_operand.vmem [shape: f32[1,256], index: 3, kind: input, shape index: {}]   ;;  %s808_s4 = inlined_call_operand.hbm [shape: f32[256,128], index: 4, kind: input, shape index: {}]   ;;  %s809_s5 = inlined_call_operand.vmem [shape: f32[1,128], index: 5, kind: input, shape index: {}]   ;;  %s810_s6 = inlined_call_operand.vmem [shape: f32[2,128], index: 6, kind: input, shape index: {}]   ;;  %s811_s7 = inlined_call_operand.hbm [shape: f32[2,8], index: 7, kind: output, shape index: {}]  }
   0x1   :  { %13 = vsyncpa [#allocation6], 0 }
   0x2   :  { %14 = vsyncpa [#allocation9], 0 }
   0x3   :  { %15 = vsyncpa [#allocation4], 0  ;;  %s729_s24 = smov [#allocation5]   ;;  %s730_s26 = smov [#allocation2]  }
   0x4   :  { %s32_s25 = sshll.u32 %s729_s24, 4  ;;  %s22_s27 = sshll.u32 %s730_s26, 4  ;;  %s33_s25 = int_to_ptr.vmem [resolvable:$true] %s32_s25  ;;  %s23_s27 = int_to_ptr.vmem [resolvable:$true] %s22_s27 }
   0x5   :  { %s629_s28 = scalar_lea.vmem %s33_s25, 32  ;;  %p634_p1 = scmp.lt.s32.totalorder %s33_s25, %s33_s25 }
   0x6   :  { %p630_p0 = scmp.ne.s32.totalorder %s33_s25, %s629_s28  ;;  %p635_p2 = scmp.lt.s32.totalorder %s629_s28, %s629_s28 }
   0x8   :  { %p636_p3 = por %p635_p2, %p634_p1 }
   0xa   :  { %p637_p4 = pnand %p636_p3, %p630_p0 }
   0xc   :  { %640 = shalt.err (!%p637_p4)
}
   0xd   :  { %35 = dma.hbm_to_vmem [thread:$0]  %s805_s1, 32, %s33_s25, [#allocation6]  }
   0xe   :  { %s649_s8 = scalar_lea.vmem %s23_s27, 512  ;;  %p654_p6 = scmp.lt.s32.totalorder %s23_s27, %s23_s27 }
   0xf   :  { %p650_p5 = scmp.ne.s32.totalorder %s23_s27, %s649_s8  ;;  %p655_p7 = scmp.lt.s32.totalorder %s649_s8, %s649_s8 }
  0x11   :  { %p656_p8 = por %p655_p7, %p654_p6 }
  0x13   :  { %p657_p9 = pnand %p656_p8, %p650_p5 }
  0x15   :  { %660 = shalt.err (!%p657_p9)
}
  0x16   :  { %25 = dma.hbm_to_vmem [thread:$0]  %s804_s0, 512, %s23_s27, [#allocation3]  }
  0x17   :  { %s731_s11 = smov [#allocation7]  }
  0x18   :  { %s41_s12 = sshll.u32 %s731_s11, 4  ;;  %s42_s12 = int_to_ptr.vmem [resolvable:$true] %s41_s12 }
  0x19   :  { %s669_s13 = scalar_lea.vmem %s42_s12, 16384  ;;  %p674_p11 = scmp.lt.s32.totalorder %s42_s12, %s42_s12 }
  0x1a   :  { %p670_p10 = scmp.ne.s32.totalorder %s42_s12, %s669_s13  ;;  %p675_p12 = scmp.lt.s32.totalorder %s669_s13, %s669_s13 }
  0x1c   :  { %p676_p13 = por %p675_p12, %p674_p11 }
  0x1e   :  { %p677_p0 = pnand %p676_p13, %p670_p10 }
  0x20   :  { %680 = shalt.err (!%p677_p0)
}
  0x21   :  { %s732_s1 = smov 256   ;;  %s733_s14 = smov 16  }
  0x22   :  { %47 = dma.hbm_to_vmem [thread:$0]  %s806_s2, 16384, %s42_s12, [#allocation6], %s732_s1, %s732_s1, %s733_s14  }
  0x23   :  { %s734_s17 = smov [#allocation8]  }
  0x24   :  { %s55_s18 = sshll.u32 %s734_s17, 4  ;;  %s56_s18 = int_to_ptr.vmem [resolvable:$true] %s55_s18 }
  0x25   :  { %s689_s0 = scalar_lea.vmem %s56_s18, 4096  ;;  %p694_p2 = scmp.lt.s32.totalorder %s56_s18, %s56_s18 }
  0x26   :  { %p690_p1 = scmp.ne.s32.totalorder %s56_s18, %s689_s0  ;;  %p695_p3 = scmp.lt.s32.totalorder %s689_s0, %s689_s0 }
  0x28   :  { %p696_p4 = por %p695_p3, %p694_p2 }
  0x2a   :  { %p697_p5 = pnand %p696_p4, %p690_p1 }
  0x2c   :  { %700 = shalt.err (!%p697_p5)
}
  0x2d   :  { %s735_s19 = smov 128   ;;  %s736_s20 = smov 8  }
  0x2e   :  { %61 = dma.hbm_to_vmem [thread:$0]  %s808_s4, 4096, %s56_s18, [#allocation9], %s735_s19, %s735_s19, %s736_s20  }
  0x2f   :  { %721 = dma.done.wait [#allocation3], 512  }
  0x30   :  { %722 = vsyncadd [#allocation3], 4294966784 }
  0x31   :  { %723 = dma.done.wait [#allocation6], 16416  }
  0x32   :  { %724 = vsyncadd [#allocation6], 4294950880 }
  0x33   :  { %725 = dma.done.wait [#allocation9], 4096  }
  0x34   :  { %726 = vsyncadd [#allocation9], 4294963200  ;;  %v113_v0 = vld [vmem:[#allocation7 + $0xf8] sm:$0xff]  ;;  %v112_v2 = vld [vmem:[#allocation7 + $0xf0] sm:$0xff]  ;;  %vm738_vm0 = vmmov 0   ;;  %s739_s26 = smov [#allocation10]  }
  0x35   :  { %v177_v1 = vld [vmem:[#allocation7 + $0x2f8] sm:$0xff]  ;;  %222 = vmatprep.subr.mxu0 %v113_v0  ;;  %v176_v3 = vld [vmem:[#allocation7 + $0x2f0] sm:$0xff]  ;;  %v111_v4 = vld [vmem:[#allocation7 + $0xe8] sm:$0xff]  ;;  %s556_s27 = sshll.u32 %s739_s26, 4  ;;  %vm548_vm1 = vcmask 58368   ;;  %s557_s27 = int_to_ptr.vmem [resolvable:$true] %s556_s27 }
  0x36   :  { %293 = vmatprep.subr.mxu1 %v177_v1  ;;  %v175_v5 = vld [vmem:[#allocation7 + $0x2e8] sm:$0xff]  ;;  %223 = vmatpush1.msra.mxu0 %v112_v2  ;;  %v110_v6 = vld [vmem:[#allocation7 + $0xe0] sm:$0xff]  ;;  %v109_v8 = vld [vmem:[#allocation7 + $0xd8] sm:$0xff]  ;;  %p706_p7 = scmp.lt.s32.totalorder %s557_s27, %s557_s27 }
  0x37   :  { %294 = vmatpush1.msra.mxu1 %v176_v3  ;;  %v174_v7 = vld [vmem:[#allocation7 + $0x2e0] sm:$0xff]  ;;  %224 = vmatprep.subr.mxu0 %v111_v4  ;;  %v173_v9 = vld [vmem:[#allocation7 + $0x2d8] sm:$0xff]  ;;  %v108_v10 = vld [vmem:[#allocation7 + $0xd0] sm:$0xff] }
  0x38   :  { %295 = vmatprep.subr.mxu1 %v175_v5  ;;  %v172_v11 = vld [vmem:[#allocation7 + $0x2d0] sm:$0xff]  ;;  %225 = vmatpush1.msra.mxu0 %v110_v6  ;;  %v107_v12 = vld [vmem:[#allocation7 + $0xc8] sm:$0xff]  ;;  %v106_v14 = vld [vmem:[#allocation7 + $0xc0] sm:$0xff] }
  0x39   :  { %296 = vmatpush1.msra.mxu1 %v174_v7  ;;  %v171_v13 = vld [vmem:[#allocation7 + $0x2c8] sm:$0xff]  ;;  %226 = vmatprep.subr.mxu0 %v109_v8  ;;  %v170_v15 = vld [vmem:[#allocation7 + $0x2c0] sm:$0xff]  ;;  %v105_v16 = vld [vmem:[#allocation7 + $0xb8] sm:$0xff] }
  0x3a   :  { %297 = vmatprep.subr.mxu1 %v173_v9  ;;  %227 = vmatpush1.msra.mxu0 %v108_v10  ;;  %v169_v17 = vld [vmem:[#allocation7 + $0x2b8] sm:$0xff]  ;;  %v104_v18 = vld [vmem:[#allocation7 + $0xb0] sm:$0xff]  ;;  %v103_v20 = vld [vmem:[#allocation7 + $0xa8] sm:$0xff] }
  0x3b   :  { %298 = vmatpush1.msra.mxu1 %v172_v11  ;;  %228 = vmatprep.subr.mxu0 %v107_v12  ;;  %v168_v19 = vld [vmem:[#allocation7 + $0x2b0] sm:$0xff]  ;;  %v167_v21 = vld [vmem:[#allocation7 + $0x2a8] sm:$0xff]  ;;  %v102_v22 = vld [vmem:[#allocation7 + $0xa0] sm:$0xff] }
  0x3c   :  { %299 = vmatprep.subr.mxu1 %v171_v13  ;;  %229 = vmatpush1.msra.mxu0 %v106_v14  ;;  %v166_v23 = vld [vmem:[#allocation7 + $0x2a0] sm:$0xff]  ;;  %v101_v24 = vld [vmem:[#allocation7 + $0x98] sm:$0xff]  ;;  %v100_v26 = vld [vmem:[#allocation7 + $0x90] sm:$0xff] }
  0x3d   :  { %300 = vmatpush1.msra.mxu1 %v170_v15  ;;  %230 = vmatprep.subr.mxu0 %v105_v16  ;;  %v165_v25 = vld [vmem:[#allocation7 + $0x298] sm:$0xff]  ;;  %v164_v27 = vld [vmem:[#allocation7 + $0x290] sm:$0xff]  ;;  %v99_v28 = vld [vmem:[#allocation7 + $0x88] sm:$0xff] }
  0x3e   :  { %301 = vmatprep.subr.mxu1 %v169_v17  ;;  %231 = vmatpush1.msra.mxu0 %v104_v18  ;;  %v163_v29 = vld [vmem:[#allocation7 + $0x288] sm:$0xff]  ;;  %v98_v30 = vld [vmem:[#allocation7 + $0x80] sm:$0xff]  ;;  %v97_v32 = vld [vmem:[#allocation7 + $0x78] sm:$0xff] }
  0x3f   :  { %302 = vmatpush1.msra.mxu1 %v168_v19  ;;  %232 = vmatprep.subr.mxu0 %v103_v20  ;;  %v162_v31 = vld [vmem:[#allocation7 + $0x280] sm:$0xff]  ;;  %v161_v33 = vld [vmem:[#allocation7 + $0x278] sm:$0xff]  ;;  %v96_v34 = vld [vmem:[#allocation7 + $0x70] sm:$0xff] }
  0x40   :  { %303 = vmatprep.subr.mxu1 %v167_v21  ;;  %233 = vmatpush1.msra.mxu0 %v102_v22  ;;  %v160_v35 = vld [vmem:[#allocation7 + $0x270] sm:$0xff]  ;;  %v95_v36 = vld [vmem:[#allocation7 + $0x68] sm:$0xff]  ;;  %v94_v38 = vld [vmem:[#allocation7 + $0x60] sm:$0xff] }
  0x41   :  { %304 = vmatpush1.msra.mxu1 %v166_v23  ;;  %234 = vmatprep.subr.mxu0 %v101_v24  ;;  %v159_v37 = vld [vmem:[#allocation7 + $0x268] sm:$0xff]  ;;  %v158_v39 = vld [vmem:[#allocation7 + $0x260] sm:$0xff]  ;;  %v93_v40 = vld [vmem:[#allocation7 + $0x58] sm:$0xff] }
  0x42   :  { %305 = vmatprep.subr.mxu1 %v165_v25  ;;  %235 = vmatpush1.msra.mxu0 %v100_v26  ;;  %v157_v41 = vld [vmem:[#allocation7 + $0x258] sm:$0xff]  ;;  %v92_v42 = vld [vmem:[#allocation7 + $0x50] sm:$0xff]  ;;  %v91_v44 = vld [vmem:[#allocation7 + $0x48] sm:$0xff] }
  0x43   :  { %306 = vmatpush1.msra.mxu1 %v164_v27  ;;  %236 = vmatprep.subr.mxu0 %v99_v28  ;;  %v156_v43 = vld [vmem:[#allocation7 + $0x250] sm:$0xff]  ;;  %v155_v45 = vld [vmem:[#allocation7 + $0x248] sm:$0xff]  ;;  %v90_v46 = vld [vmem:[#allocation7 + $0x40] sm:$0xff] }
  0x44   :  { %307 = vmatprep.subr.mxu1 %v163_v29  ;;  %237 = vmatpush1.msra.mxu0 %v98_v30  ;;  %v154_v47 = vld [vmem:[#allocation7 + $0x240] sm:$0xff]  ;;  %v89_v48 = vld [vmem:[#allocation7 + $0x38] sm:$0xff]  ;;  %v88_v50 = vld [vmem:[#allocation7 + $0x30] sm:$0xff] }
  0x45   :  { %308 = vmatpush1.msra.mxu1 %v162_v31  ;;  %238 = vmatprep.subr.mxu0 %v97_v32  ;;  %v153_v49 = vld [vmem:[#allocation7 + $0x238] sm:$0xff]  ;;  %v152_v51 = vld [vmem:[#allocation7 + $0x230] sm:$0xff]  ;;  %v87_v52 = vld [vmem:[#allocation7 + $0x28] sm:$0xff] }
  0x46   :  { %309 = vmatprep.subr.mxu1 %v161_v33  ;;  %239 = vmatpush1.msra.mxu0 %v96_v34  ;;  %v151_v53 = vld [vmem:[#allocation7 + $0x228] sm:$0xff]  ;;  %v86_v54 = vld [vmem:[#allocation7 + $0x20] sm:$0xff]  ;;  %v85_v56 = vld [vmem:[#allocation7 + $0x18] sm:$0xff] }
  0x47   :  { %310 = vmatpush1.msra.mxu1 %v160_v35  ;;  %240 = vmatprep.subr.mxu0 %v95_v36  ;;  %v150_v55 = vld [vmem:[#allocation7 + $0x220] sm:$0xff]  ;;  %v149_v57 = vld [vmem:[#allocation7 + $0x218] sm:$0xff]  ;;  %v84_v58 = vld [vmem:[#allocation7 + $0x10] sm:$0xff] }
  0x48   :  { %311 = vmatprep.subr.mxu1 %v159_v37  ;;  %241 = vmatpush1.msra.mxu0 %v94_v38  ;;  %v148_v59 = vld [vmem:[#allocation7 + $0x210] sm:$0xff]  ;;  %v83_v60 = vld [vmem:[#allocation7 + $0x8] sm:$0xff]  ;;  %v82_v62 = vld [vmem:[#allocation7] sm:$0xff] }
  0x49   :  { %312 = vmatpush1.msra.mxu1 %v158_v39  ;;  %242 = vmatprep.subr.mxu0 %v93_v40  ;;  %v147_v61 = vld [vmem:[#allocation7 + $0x208] sm:$0xff]  ;;  %v146_v63 = vld [vmem:[#allocation7 + $0x200] sm:$0xff]  ;;  %v145_v0 = vld [vmem:[#allocation7 + $0x1f8] sm:$0xff] }
  0x4a   :  { %313 = vmatprep.subr.mxu1 %v157_v41  ;;  %243 = vmatpush1.msra.mxu0 %v92_v42  ;;  %v209_v1 = vld [vmem:[#allocation7 + $0x3f8] sm:$0xff]  ;;  %v144_v2 = vld [vmem:[#allocation7 + $0x1f0] sm:$0xff]  ;;  %v143_v4 = vld [vmem:[#allocation7 + $0x1e8] sm:$0xff] }
  0x4b   :  { %314 = vmatpush1.msra.mxu1 %v156_v43  ;;  %244 = vmatprep.subr.mxu0 %v91_v44  ;;  %v208_v3 = vld [vmem:[#allocation7 + $0x3f0] sm:$0xff]  ;;  %v207_v5 = vld [vmem:[#allocation7 + $0x3e8] sm:$0xff]  ;;  %v142_v6 = vld [vmem:[#allocation7 + $0x1e0] sm:$0xff] }
  0x4c   :  { %315 = vmatprep.subr.mxu1 %v155_v45  ;;  %245 = vmatpush1.msra.mxu0 %v90_v46  ;;  %v206_v7 = vld [vmem:[#allocation7 + $0x3e0] sm:$0xff]  ;;  %v141_v8 = vld [vmem:[#allocation7 + $0x1d8] sm:$0xff]  ;;  %v140_v10 = vld [vmem:[#allocation7 + $0x1d0] sm:$0xff] }
  0x4d   :  { %316 = vmatpush1.msra.mxu1 %v154_v47  ;;  %246 = vmatprep.subr.mxu0 %v89_v48  ;;  %v205_v9 = vld [vmem:[#allocation7 + $0x3d8] sm:$0xff]  ;;  %v204_v11 = vld [vmem:[#allocation7 + $0x3d0] sm:$0xff]  ;;  %v139_v12 = vld [vmem:[#allocation7 + $0x1c8] sm:$0xff] }
  0x4e   :  { %317 = vmatprep.subr.mxu1 %v153_v49  ;;  %247 = vmatpush1.msra.mxu0 %v88_v50  ;;  %v203_v13 = vld [vmem:[#allocation7 + $0x3c8] sm:$0xff]  ;;  %v138_v14 = vld [vmem:[#allocation7 + $0x1c0] sm:$0xff]  ;;  %v137_v16 = vld [vmem:[#allocation7 + $0x1b8] sm:$0xff] }
  0x4f   :  { %318 = vmatpush1.msra.mxu1 %v152_v51  ;;  %248 = vmatprep.subr.mxu0 %v87_v52  ;;  %v202_v15 = vld [vmem:[#allocation7 + $0x3c0] sm:$0xff]  ;;  %v201_v17 = vld [vmem:[#allocation7 + $0x3b8] sm:$0xff]  ;;  %v136_v18 = vld [vmem:[#allocation7 + $0x1b0] sm:$0xff] }
  0x50   :  { %319 = vmatprep.subr.mxu1 %v151_v53  ;;  %249 = vmatpush1.msra.mxu0 %v86_v54  ;;  %v200_v19 = vld [vmem:[#allocation7 + $0x3b0] sm:$0xff]  ;;  %v135_v20 = vld [vmem:[#allocation7 + $0x1a8] sm:$0xff]  ;;  %v134_v22 = vld [vmem:[#allocation7 + $0x1a0] sm:$0xff] }
  0x51   :  { %320 = vmatpush1.msra.mxu1 %v150_v55  ;;  %250 = vmatprep.subr.mxu0 %v85_v56  ;;  %v199_v21 = vld [vmem:[#allocation7 + $0x3a8] sm:$0xff]  ;;  %v198_v23 = vld [vmem:[#allocation7 + $0x3a0] sm:$0xff]  ;;  %v133_v24 = vld [vmem:[#allocation7 + $0x198] sm:$0xff] }
  0x52   :  { %321 = vmatprep.subr.mxu1 %v149_v57  ;;  %251 = vmatpush1.msra.mxu0 %v84_v58  ;;  %v197_v25 = vld [vmem:[#allocation7 + $0x398] sm:$0xff]  ;;  %v132_v26 = vld [vmem:[#allocation7 + $0x190] sm:$0xff]  ;;  %v131_v28 = vld [vmem:[#allocation7 + $0x188] sm:$0xff] }
  0x53   :  { %322 = vmatpush1.msra.mxu1 %v148_v59  ;;  %252 = vmatprep.subr.mxu0 %v83_v60  ;;  %v196_v27 = vld [vmem:[#allocation7 + $0x390] sm:$0xff]  ;;  %v195_v29 = vld [vmem:[#allocation7 + $0x388] sm:$0xff]  ;;  %v130_v30 = vld [vmem:[#allocation7 + $0x180] sm:$0xff] }
  0x54   :  { %323 = vmatprep.subr.mxu1 %v147_v61  ;;  %253 = vmatpush1.msra.mxu0 %v82_v62  ;;  %v194_v31 = vld [vmem:[#allocation7 + $0x380] sm:$0xff]  ;;  %v129_v32 = vld [vmem:[#allocation7 + $0x178] sm:$0xff]  ;;  %v128_v34 = vld [vmem:[#allocation7 + $0x170] sm:$0xff] }
  0x55   :  { %324 = vmatpush1.msra.mxu1 %v146_v63  ;;  %254 = vmatprep.subr.mxu0 %v145_v0  ;;  %v193_v33 = vld [vmem:[#allocation7 + $0x378] sm:$0xff]  ;;  %v192_v35 = vld [vmem:[#allocation7 + $0x370] sm:$0xff]  ;;  %v127_v36 = vld [vmem:[#allocation7 + $0x168] sm:$0xff] }
  0x56   :  { %325 = vmatprep.subr.mxu1 %v209_v1  ;;  %255 = vmatpush2.msra.mxu0 %v144_v2  ;;  %v191_v37 = vld [vmem:[#allocation7 + $0x368] sm:$0xff]  ;;  %v126_v38 = vld [vmem:[#allocation7 + $0x160] sm:$0xff]  ;;  %v125_v40 = vld [vmem:[#allocation7 + $0x158] sm:$0xff] }
  0x57   :  { %326 = vmatpush2.msra.mxu1 %v208_v3  ;;  %256 = vmatprep.subr.mxu0 %v143_v4  ;;  %v190_v39 = vld [vmem:[#allocation7 + $0x360] sm:$0xff]  ;;  %v189_v41 = vld [vmem:[#allocation7 + $0x358] sm:$0xff]  ;;  %v124_v42 = vld [vmem:[#allocation7 + $0x150] sm:$0xff] }
  0x58   :  { %327 = vmatprep.subr.mxu1 %v207_v5  ;;  %257 = vmatpush2.msra.mxu0 %v142_v6  ;;  %v188_v43 = vld [vmem:[#allocation7 + $0x350] sm:$0xff]  ;;  %v123_v44 = vld [vmem:[#allocation7 + $0x148] sm:$0xff]  ;;  %v122_v46 = vld [vmem:[#allocation7 + $0x140] sm:$0xff] }
  0x59   :  { %328 = vmatpush2.msra.mxu1 %v206_v7  ;;  %258 = vmatprep.subr.mxu0 %v141_v8  ;;  %v187_v45 = vld [vmem:[#allocation7 + $0x348] sm:$0xff]  ;;  %v186_v47 = vld [vmem:[#allocation7 + $0x340] sm:$0xff]  ;;  %v121_v48 = vld [vmem:[#allocation7 + $0x138] sm:$0xff] }
  0x5a   :  { %329 = vmatprep.subr.mxu1 %v205_v9  ;;  %259 = vmatpush2.msra.mxu0 %v140_v10  ;;  %v185_v49 = vld [vmem:[#allocation7 + $0x338] sm:$0xff]  ;;  %v120_v50 = vld [vmem:[#allocation7 + $0x130] sm:$0xff]  ;;  %v119_v52 = vld [vmem:[#allocation7 + $0x128] sm:$0xff] }
  0x5b   :  { %330 = vmatpush2.msra.mxu1 %v204_v11  ;;  %260 = vmatprep.subr.mxu0 %v139_v12  ;;  %v184_v51 = vld [vmem:[#allocation7 + $0x330] sm:$0xff]  ;;  %v183_v53 = vld [vmem:[#allocation7 + $0x328] sm:$0xff]  ;;  %v118_v54 = vld [vmem:[#allocation7 + $0x120] sm:$0xff] }
  0x5c   :  { %331 = vmatprep.subr.mxu1 %v203_v13  ;;  %261 = vmatpush2.msra.mxu0 %v138_v14  ;;  %v182_v55 = vld [vmem:[#allocation7 + $0x320] sm:$0xff]  ;;  %v117_v56 = vld [vmem:[#allocation7 + $0x118] sm:$0xff]  ;;  %v116_v58 = vld [vmem:[#allocation7 + $0x110] sm:$0xff] }
  0x5d   :  { %332 = vmatpush2.msra.mxu1 %v202_v15  ;;  %262 = vmatprep.subr.mxu0 %v137_v16  ;;  %v181_v57 = vld [vmem:[#allocation7 + $0x318] sm:$0xff]  ;;  %v180_v59 = vld [vmem:[#allocation7 + $0x310] sm:$0xff]  ;;  %v115_v60 = vld [vmem:[#allocation7 + $0x108] sm:$0xff] }
  0x5e   :  { %333 = vmatprep.subr.mxu1 %v201_v17  ;;  %263 = vmatpush2.msra.mxu0 %v136_v18  ;;  %v179_v61 = vld [vmem:[#allocation7 + $0x308] sm:$0xff]  ;;  %v114_v62 = vld [vmem:[#allocation7 + $0x100] sm:$0xff]  ;;  %v81_v1 = vld [vmem:[#allocation2 + $0x18] sm:$0xff] }
  0x5f   :  { %334 = vmatpush2.msra.mxu1 %v200_v19  ;;  %264 = vmatprep.subr.mxu0 %v135_v20  ;;  %v79_v63 = vld [vmem:[#allocation2 + $0x8] sm:$0xff]  ;;  %v78_v2 = vld [vmem:[#allocation2] sm:$0xff]  ;;  %v80_v3 = vld [vmem:[#allocation2 + $0x10] sm:$0xff] }
  0x60   :  { %335 = vmatprep.subr.mxu1 %v199_v21  ;;  %265 = vmatpush2.msra.mxu0 %v134_v22  ;;  %v178_v0 = vld [vmem:[#allocation7 + $0x300] sm:$0xff]  ;;  %v397_v4 = vld [vmem:[#allocation8 + $0xf8] sm:$0xff]  ;;  %v396_v6 = vld [vmem:[#allocation8 + $0xf0] sm:$0xff] }
  0x61   :  { %336 = vmatpush2.msra.mxu1 %v198_v23  ;;  %266 = vmatprep.subr.mxu0 %v133_v24  ;;  %v381_v5 = vld [vmem:[#allocation8 + $0x78] sm:$0xff]  ;;  %v380_v7 = vld [vmem:[#allocation8 + $0x70] sm:$0xff]  ;;  %v395_v8 = vld [vmem:[#allocation8 + $0xe8] sm:$0xff] }
  0x62   :  { %337 = vmatprep.subr.mxu1 %v197_v25  ;;  %267 = vmatpush2.msra.mxu0 %v132_v26  ;;  %v379_v9 = vld [vmem:[#allocation8 + $0x68] sm:$0xff]  ;;  %v394_v10 = vld [vmem:[#allocation8 + $0xe0] sm:$0xff]  ;;  %v393_v12 = vld [vmem:[#allocation8 + $0xd8] sm:$0xff] }
  0x63   :  { %338 = vmatpush2.msra.mxu1 %v196_v27  ;;  %268 = vmatprep.subr.mxu0 %v131_v28  ;;  %v378_v11 = vld [vmem:[#allocation8 + $0x60] sm:$0xff]  ;;  %v377_v13 = vld [vmem:[#allocation8 + $0x58] sm:$0xff]  ;;  %v392_v14 = vld [vmem:[#allocation8 + $0xd0] sm:$0xff] }
  0x64   :  { %339 = vmatprep.subr.mxu1 %v195_v29  ;;  %269 = vmatpush2.msra.mxu0 %v130_v30  ;;  %v376_v15 = vld [vmem:[#allocation8 + $0x50] sm:$0xff]  ;;  %v391_v16 = vld [vmem:[#allocation8 + $0xc8] sm:$0xff]  ;;  %v390_v18 = vld [vmem:[#allocation8 + $0xc0] sm:$0xff] }
  0x65   :  { %340 = vmatpush2.msra.mxu1 %v194_v31  ;;  %270 = vmatprep.subr.mxu0 %v129_v32  ;;  %v375_v17 = vld [vmem:[#allocation8 + $0x48] sm:$0xff]  ;;  %v374_v19 = vld [vmem:[#allocation8 + $0x40] sm:$0xff]  ;;  %v389_v20 = vld [vmem:[#allocation8 + $0xb8] sm:$0xff] }
  0x66   :  { %341 = vmatprep.subr.mxu1 %v193_v33  ;;  %271 = vmatpush2.msra.mxu0 %v128_v34  ;;  %v373_v21 = vld [vmem:[#allocation8 + $0x38] sm:$0xff]  ;;  %v388_v22 = vld [vmem:[#allocation8 + $0xb0] sm:$0xff]  ;;  %v387_v24 = vld [vmem:[#allocation8 + $0xa8] sm:$0xff] }
  0x67   :  { %342 = vmatpush2.msra.mxu1 %v192_v35  ;;  %272 = vmatprep.subr.mxu0 %v127_v36  ;;  %v372_v23 = vld [vmem:[#allocation8 + $0x30] sm:$0xff]  ;;  %v371_v25 = vld [vmem:[#allocation8 + $0x28] sm:$0xff]  ;;  %v386_v26 = vld [vmem:[#allocation8 + $0xa0] sm:$0xff]  ;;  %v212_v36 = vlaneseq }
  0x68   :  { %343 = vmatprep.subr.mxu1 %v191_v37  ;;  %273 = vmatpush2.msra.mxu0 %v126_v38  ;;  %v370_v27 = vld [vmem:[#allocation8 + $0x20] sm:$0xff]  ;;  %v385_v28 = vld [vmem:[#allocation8 + $0x98] sm:$0xff]  ;;  %v384_v30 = vld [vmem:[#allocation8 + $0x90] sm:$0xff] }
  0x69   :  { %344 = vmatpush2.msra.mxu1 %v190_v39  ;;  %274 = vmatprep.subr.mxu0 %v125_v40  ;;  %v369_v29 = vld [vmem:[#allocation8 + $0x18] sm:$0xff]  ;;  %v368_v31 = vld [vmem:[#allocation8 + $0x10] sm:$0xff]  ;;  %v383_v32 = vld [vmem:[#allocation8 + $0x88] sm:$0xff]  ;;  %v213_v37 = vshrl.u32 %v212_v36, 7 }
  0x6a   :  { %345 = vmatprep.subr.mxu1 %v189_v41  ;;  %275 = vmatpush2.msra.mxu0 %v124_v42  ;;  %v367_v33 = vld [vmem:[#allocation8 + $0x8] sm:$0xff]  ;;  %v382_v34 = vld [vmem:[#allocation8 + $0x80] sm:$0xff]  ;;  %v210_v39 = vld [vmem:[%s807_s3] sm:$0x3] }
  0x6b   :  { %346 = vmatpush2.msra.mxu1 %v188_v43  ;;  %276 = vmatprep.subr.mxu0 %v123_v44  ;;  %v366_v35 = vld [vmem:[#allocation8] sm:$0xff]  ;;  %v214_v38 = vsub.s32 0, %v213_v37  ;;  %v218_v40 = vsub.s32 1, %v213_v37 }
  0x6c   :  { %347 = vmatprep.subr.mxu1 %v187_v45  ;;  %277 = vmatpush2.msra.mxu0 %v122_v46 }
  0x6d   :  { %348 = vmatpush2.msra.mxu1 %v186_v47  ;;  %278 = vmatprep.subr.mxu0 %v121_v48  ;;  %v215_v41 = vrot.slane %v210_v39, %v214_v38  ;;  %v219_v42 = vrot.slane %v210_v39, %v218_v40 }
  0x6e   :  { %349 = vmatprep.subr.mxu1 %v185_v49  ;;  %279 = vmatpush2.msra.mxu0 %v120_v50 }
  0x6f   :  { %350 = vmatpush2.msra.mxu1 %v184_v51  ;;  %280 = vmatprep.subr.mxu0 %v119_v52 }
  0x70   :  { %351 = vmatprep.subr.mxu1 %v183_v53  ;;  %281 = vmatpush2.msra.mxu0 %v118_v54  ;;  %v737_v53 = vmov 0.0  }
  0x71   :  { %352 = vmatpush2.msra.mxu1 %v182_v55  ;;  %282 = vmatprep.subr.mxu0 %v117_v56  ;;  %v567_v55 = vld [vmem:[%s809_s5] ss:$0 sm:$0xff]  ;;  %s701_s5 = scalar_lea.vmem %s557_s27, 32 }
  0x72   :  { %353 = vmatprep.subr.mxu1 %v181_v57  ;;  %283 = vmatpush2.msra.mxu0 %v116_v58  ;;  %p702_p6 = scmp.ne.s32.totalorder %s557_s27, %s701_s5  ;;  %p707_p8 = scmp.lt.s32.totalorder %s701_s5, %s701_s5 }
  0x73   :  { %354 = vmatpush2.msra.mxu1 %v180_v59  ;;  %284 = vmatprep.subr.mxu0 %v115_v60  ;;  %v476_v60 = vld [vmem:[%s810_s6] sm:$0x3] }
  0x74   :  { %355 = vmatprep.subr.mxu1 %v179_v61  ;;  %285 = vmatpush2.msra.mxu0 %v114_v62  ;;  %v477_v61 = vld [vmem:[#allocation5] sm:$0x3]  ;;  %p708_p9 = por %p707_p8, %p706_p7 }
  0x75   :  { %286 = vmatprep.mubr.f32.mxu0 %v79_v63  ;;  %356 = vmatpush2.msra.mxu1 %v178_v0 }
  0x76   :  { %357 = vmatprep.mubr.f32.mxu1 %v81_v1  ;;  %287 = vmatmul.mubr.f32.vlgmr.msra.gmra.mxu0 %v78_v2  ;;  %p709_p10 = pnand %p708_p9, %p702_p6 }
  0x77   :  { %358 = vmatmul.mubr.f32.vlgmr.msra.gmra.mxu1 %v80_v3  ;;  %568 = vmatprep.subr.mxu0 %v397_v4 }
  0x78   :  { %569 = vmatpush3.msra.mxu0 %v381_v5  ;;  %605 = vmatprep.subr.mxu1 %v737_v53 }
  0x79   :  { %570 = vmatprep.subr.mxu0 %v396_v6  ;;  %607 = vmatprep.mubr.msk.f32.mxu1 %vm738_vm0, %v737_v53 }
  0x7a   :  { %571 = vmatpush3.msra.mxu0 %v380_v7 }
  0x7b   :  { %572 = vmatprep.subr.mxu0 %v395_v8 }
  0x7c   :  { %573 = vmatpush3.msra.mxu0 %v379_v9 }
  0x7d   :  { %574 = vmatprep.subr.mxu0 %v394_v10 }
  0x7e   :  { %575 = vmatpush3.msra.mxu0 %v378_v11 }
  0x7f   :  { %576 = vmatprep.subr.mxu0 %v393_v12 }
  0x80   :  { %577 = vmatpush3.msra.mxu0 %v377_v13 }
  0x81   :  { %578 = vmatprep.subr.mxu0 %v392_v14 }
  0x82   :  { %579 = vmatpush3.msra.mxu0 %v376_v15 }
  0x83   :  { %580 = vmatprep.subr.mxu0 %v391_v16 }
  0x84   :  { %581 = vmatpush3.msra.mxu0 %v375_v17 }
  0x85   :  { %582 = vmatprep.subr.mxu0 %v390_v18 }
  0x86   :  { %583 = vmatpush3.msra.mxu0 %v374_v19 }
  0x87   :  { %584 = vmatprep.subr.mxu0 %v389_v20 }
  0x88   :  { %585 = vmatpush3.msra.mxu0 %v373_v21 }
  0x89   :  { %586 = vmatprep.subr.mxu0 %v388_v22 }
  0x8a   :  { %587 = vmatpush3.msra.mxu0 %v372_v23 }
  0x8b   :  { %588 = vmatprep.subr.mxu0 %v387_v24 }
  0x8c   :  { %589 = vmatpush3.msra.mxu0 %v371_v25 }
  0x8d   :  { %590 = vmatprep.subr.mxu0 %v386_v26 }
  0x8e   :  { %591 = vmatpush3.msra.mxu0 %v370_v27 }
  0x8f   :  { %592 = vmatprep.subr.mxu0 %v385_v28 }
  0x90   :  { %593 = vmatpush3.msra.mxu0 %v369_v29 }
  0x91   :  { %594 = vmatprep.subr.mxu0 %v384_v30 }
  0x92   :  { %595 = vmatpush3.msra.mxu0 %v368_v31 }
  0x93   :  { %596 = vmatprep.subr.mxu0 %v383_v32 }
  0x94   :  { %597 = vmatpush3.msra.mxu0 %v367_v33 }
  0x95   :  { %598 = vmatprep.subr.mxu0 %v382_v34 }
  0x96   :  { %599 = vmatpush3.msra.mxu0 %v366_v35 }
 0x136   :  { %v288_v43 = vpop.f32.mrf.mxu0 }
 0x137   :  { %v359_v44 = vpop.f32.mrf.mxu1  ;;  %v289_v45 = vadd.f32 %v288_v43, %v215_v41 }
 0x138   :  { %v290_v46 = vpop.f32.mrf.mxu0 }
 0x139   :  { %v291_v47 = vadd.f32 %v290_v46, %v219_v42  ;;  %v360_v48 = vadd.f32 %v359_v44, %v289_v45  ;;  %v361_v49 = vpop.f32.mrf.mxu1 }
 0x13b   :  { %v362_v50 = vadd.f32 %v361_v49, %v291_v47  ;;  %v364_v52 = vmax.f32 %v360_v48, 0.0 }
 0x13d   :  { %v365_v51 = vmax.f32 %v362_v50, 0.0 }
 0x13f   :  { %469 = vmatprep.mubr.f32.mxu0 %v365_v51 }
 0x140   :  { %470 = vmatmul.mubr.f32.vlgmr.msra.gmra.mxu0 %v364_v52 }
 0x200   :  { %v600_v54 = vpop.f32.mrf.mxu0 }
 0x202   :  { %v601_v56 = vpop.f32.mrf.mxu0 }
 0x203   :  { %v602_v57 = vadd.f32 %v601_v56, %v600_v54 }
 0x205   :  { %v472_v58 = vadd.f32 %v602_v57, %v567_v55 }
 0x207   :  { %v475_v59 = vmax.f32 %v472_v58, 0.0 }
 0x209   :  { %606 = vmatpush3.xpose.msra.mxu1 %v475_v59 }
 0x20c   :  { %608 = vmatmul.mubr.f32.vlgmr.msra.gmra.mxu1 %v476_v60 }
 0x2cc   :  { %v544_v62 = vpop.f32.mrf.mxu1 }
 0x2cd   :  { %v545_v63 = vadd.f32 %v544_v62, %v477_v61 }
 0x2ce   :  { %v609_v0 = vpop.f32.mrf.mxu1 }
 0x2cf   :  { %549 = vst.msk [vmem:[#allocation10] sm:$0x3] %vm548_vm1, %v545_v63 }
 0x2d0   :  { %712 = shalt.err (!%p709_p10)
}
 0x2d1   :  { %559 = dma.vmem_to_hbm [thread:$0]  %s557_s27, 32, %s811_s7, [#allocation4]  }
 0x2d2   :  { %727 = dma.done.wait [#allocation4], 32  }
 0x2d3   :  { %728 = vsyncadd [#allocation4], 4294967264 }
 0x2d4   :  { %563 = vsyncpa [#allocation3], 1 }
 0x2d5   :  { %564 = vsyncpa [#allocation6], 1 }
 0x2d6   :  { %565 = vsyncpa [#allocation9], 1 }
 0x2d7   :  { %566 = vsyncpa [#allocation4], 1 }

</bundles_post_ra>
